<compile_context>
chip_gen: v5e
topology: v5e:2x2
jax: 0.10.0
libtpu: 0.0.40
codegen_flags: <defaults>
</compile_context>

<pallas_src>
import jax
import jax.numpy as jnp
from jax.experimental import pallas as pl
from jax.experimental.pallas import tpu as pltpu

LANE = 128          # lane (last-dim) width of a TPU vreg
SUBLANE = 8         # f32 sublane width
TB_MAX = 2048       # max batch tile; amortizes grid-step overhead, tiny vs VMEM
VPU_FC1_MAX_D = 8   # contraction depths <= this run fc1 as VPU FMAs, not MXU


def _round_up(n, m):
    return ((n + m - 1) // m) * m


def _pad_axis_to(a, axis, target):
    size = a.shape[axis]
    if size == target:
        return a
    widths = [(0, 0)] * a.ndim
    widths[axis] = (0, target - size)
    return jnp.pad(a, widths)


def _mlp_kernel(x_ref, w1_ref, b1_ref, w2_ref, b2_ref, o_ref):
    x = x_ref[...]                       # (TB, D)  f32
    w1 = w1_ref[...]                     # (D, Hp)  f32
    D = x.shape[1]

    # fc1: tiny K -> D rank-1 broadcast-FMAs on the VPU (exact f32, keeps the
    # MXU free and avoids a K=2 relayout); otherwise fall back to the MXU.
    if D <= VPU_FC1_MAX_D:
        h = x[:, 0:1] * w1[0:1, :]
        for d in range(1, D):            # static unroll
            h = h + x[:, d:d + 1] * w1[d:d + 1, :]
    else:
        h = jnp.dot(x, w1, preferred_element_type=jnp.float32)
    h = jnp.maximum(h + b1_ref[...], 0.0)                      # (TB, Hp) f32

    # fc2: bf16 MXU inputs, f32 accumulation, f32 bias add; store only the
    # real C output columns (lane-masked VMEM store, but minimal HBM writeback).
    o = jnp.dot(h.astype(jnp.bfloat16), w2_ref[...],
                preferred_element_type=jnp.float32)            # (TB, C) f32
    o_ref[...] = (o + b2_ref[...]).astype(o_ref.dtype)


def prepare_params(w1, b1, w2, b2):
    """Pad/cast params once, off the forward hot path.

    w1: (D, H), b1: (H,) or (1, H), w2: (H, C), b2: (C,) or (1, C).
    Hidden dim is zero-padded to a multiple of 128 (lane-dense h). Padded b1
    columns are 0 -> ReLU(0) = 0, padded w2 rows are 0 -> no effect on output.
    """
    D, H = w1.shape
    C = w2.shape[1]
    Hp = _round_up(H, LANE)
    w1p = _pad_axis_to(w1.astype(jnp.float32), 1, Hp)                        # (D, Hp) f32
    b1p = _pad_axis_to(jnp.reshape(b1, (1, H)).astype(jnp.float32), 1, Hp)   # (1, Hp) f32
    w2p = _pad_axis_to(w2, 0, Hp).astype(jnp.bfloat16)                       # (Hp, C) bf16
    b2p = jnp.reshape(b2, (1, C)).astype(jnp.float32)                        # (1, C)  f32
    return w1p, b1p, w2p, b2p


def classifier_forward(x, w1p, b1p, w2p, b2p):
    """Fused Linear(D->H) + ReLU + Linear(H->C). x: (B, D) f32 -> (B, C) f32."""
    B, D = x.shape
    Hp = w1p.shape[1]
    C = w2p.shape[1]

    # Batch tiling: minimal padding; >=2 tiles (when B allows) so v7x's two
    # TensorCores both get work under dimension_semantics=("parallel",).
    B8 = _round_up(B, SUBLANE)
    num_tiles = pl.cdiv(B8, TB_MAX)
    if B8 >= 2 * SUBLANE:
        num_tiles = max(num_tiles, 2)
    TB = _round_up(pl.cdiv(B8, num_tiles), SUBLANE)
    Bp = TB * num_tiles

    xp = _pad_axis_to(x.astype(jnp.float32), 0, Bp)            # (Bp, D) f32

    flops = 2 * Bp * (D * Hp + Hp * C)
    bytes_accessed = (xp.size * 4 + w1p.size * 4 + b1p.size * 4
                      + w2p.size * 2 + b2p.size * 4 + Bp * C * 4)

    out = pl.pallas_call(
        _mlp_kernel,
        out_shape=jax.ShapeDtypeStruct((Bp, C), jnp.float32),
        grid=(num_tiles,),
        in_specs=[
            pl.BlockSpec((TB, D), lambda i: (i, 0)),     # x: tiled over batch
            pl.BlockSpec((D, Hp), lambda i: (0, 0)),     # w1: resident across grid
            pl.BlockSpec((1, Hp), lambda i: (0, 0)),     # b1
            pl.BlockSpec((Hp, C), lambda i: (0, 0)),     # w2
            pl.BlockSpec((1, C), lambda i: (0, 0)),      # b2
        ],
        out_specs=pl.BlockSpec((TB, C), lambda i: (i, 0)),
        compiler_params=pltpu.CompilerParams(
            dimension_semantics=("parallel",)),
        cost_estimate=pl.CostEstimate(
            flops=flops, transcendentals=0, bytes_accessed=bytes_accessed),
    )(xp, w1p, b1p, w2p, b2p)

    # Strip batch padding (no column slice: output already has the true C width).
    return out[:B] if Bp != B else out


def init_params(key, input_dim=2, units=64, num_classes=10):
    """Synthetic params matching nn.Linear init ranges.

    PyTorch stores Linear weight as (out, in); we keep (in, out) so the kernel
    computes x @ W (mathematically identical to x @ weight.T)."""
    k1, k2, k3, k4 = jax.random.split(key, 4)
    s1 = 1.0 / jnp.sqrt(input_dim)
    s2 = 1.0 / jnp.sqrt(units)
    w1 = jax.random.uniform(k1, (input_dim, units), jnp.float32, -s1, s1)
    b1 = jax.random.uniform(k2, (1, units), jnp.float32, -s1, s1)
    w2 = jax.random.uniform(k3, (units, num_classes), jnp.float32, -s2, s2)
    b2 = jax.random.uniform(k4, (1, num_classes), jnp.float32, -s2, s2)
    return w1, b1, w2, b2


def _reference(x, w1, b1, w2, b2):
    # Mirrors the kernel numerics: fc1 as exact-f32 unrolled FMAs, fc2 as a
    # bf16-input dot with f32 accumulation and f32 bias add.
    D = x.shape[1]
    h = x[:, 0:1] * w1[0:1, :]
    for d in range(1, D):
        h = h + x[:, d:d + 1] * w1[d:d + 1, :]
    h = jnp.maximum(h + b1, 0.0)
    return jnp.dot(h.astype(jnp.bfloat16), w2.astype(jnp.bfloat16),
                   preferred_element_type=jnp.float32) + b2


if __name__ == "__main__":
    key = jax.random.PRNGKey(0)
    kx1, kx2, kp = jax.random.split(key, 3)

    input_dim, units, num_classes = 2, 64, 10
    w1, b1, w2, b2 = init_params(kp, input_dim, units, num_classes)
    # Pad/cast weights ONCE, off the per-call hot path.
    params = jax.block_until_ready(prepare_params(w1, b1, w2, b2))

    fwd = jax.jit(classifier_forward)

    # Small batch: two TB=8 tiles (both v7x TensorCores busy), no feature padding
    # visible to the output.
    x_small = jax.random.normal(kx1, (16, input_dim), jnp.float32)
    out_small = jax.block_until_ready(fwd(x_small, *params))
    assert out_small.shape == (16, num_classes)
    ref_small = _reference(x_small, w1, b1, w2, b2)
    assert jnp.allclose(out_small, ref_small, atol=1e-4, rtol=1e-4)

    # Larger ragged batch: exercises minimal batch padding (600 -> 2 x 304 tiles)
    # and the multi-step pipelined grid.
    x_big = jax.random.normal(kx2, (600, input_dim), jnp.float32)
    out_big = jax.block_until_ready(fwd(x_big, *params))
    assert out_big.shape == (600, num_classes)
    ref_big = _reference(x_big, w1, b1, w2, b2)
    assert jnp.allclose(out_big, ref_big, atol=1e-4, rtol=1e-4)

    # Loose sanity check against the pure-f32 PyTorch math (fc1 is exact f32;
    # only fc2's bf16 MXU inputs introduce small drift).
    ref_f32 = jnp.maximum(x_small @ w1 + b1, 0.0) @ w2 + b2
    assert jnp.allclose(out_small, ref_f32, atol=5e-2, rtol=5e-2)

    print("KERNEL_OK")
</pallas_src>

<mosaic_0001>
module attributes {stable_mosaic.version = 11 : i64} {
  func.func @_mlp_kernel(%arg0: i32, %arg1: memref<8x2xf32, #tpu.memory_space<vmem>>, %arg2: memref<2x128xf32, #tpu.memory_space<vmem>>, %arg3: memref<1x128xf32, #tpu.memory_space<vmem>>, %arg4: memref<128x10xbf16, #tpu.memory_space<vmem>>, %arg5: memref<1x10xf32, #tpu.memory_space<vmem>>, %arg6: memref<8x10xf32, #tpu.memory_space<vmem>>) attributes {dimension_semantics = [#tpu.dimension_semantics<parallel>], iteration_bounds = array<i64: 2>, scalar_prefetch = 0 : i64, scratch_operands = 0 : i64, tpu.core_type = #tpu.core_type<tc>, window_params = [{transform_indices = @transform_0, window_bounds = array<i64: 8, 2>}, {pipeline_mode = #tpu.pipeline_mode<synchronous>, transform_indices = @transform_1, window_bounds = array<i64: 2, 128>}, {pipeline_mode = #tpu.pipeline_mode<synchronous>, transform_indices = @transform_2, window_bounds = array<i64: 1, 128>}, {pipeline_mode = #tpu.pipeline_mode<synchronous>, transform_indices = @transform_3, window_bounds = array<i64: 128, 10>}, {pipeline_mode = #tpu.pipeline_mode<synchronous>, transform_indices = @transform_4, window_bounds = array<i64: 1, 10>}, {transform_indices = @transform_5, window_bounds = array<i64: 8, 10>}]} {
    %c0 = arith.constant 0 : index
    %c0_0 = arith.constant 0 : index
    %0 = vector.load %arg1[%c0, %c0_0] : memref<8x2xf32, #tpu.memory_space<vmem>>, vector<8x2xf32>
    %c0_1 = arith.constant 0 : index
    %c0_2 = arith.constant 0 : index
    %1 = vector.load %arg2[%c0_1, %c0_2] : memref<2x128xf32, #tpu.memory_space<vmem>>, vector<2x128xf32>
    %2 = vector.extract_strided_slice %0 {offsets = [0, 0], sizes = [8, 1], strides = [1, 1]} : vector<8x2xf32> to vector<8x1xf32>
    %3 = vector.extract_strided_slice %1 {offsets = [0, 0], sizes = [1, 128], strides = [1, 1]} : vector<2x128xf32> to vector<1x128xf32>
    %4 = vector.broadcast %2 : vector<8x1xf32> to vector<8x128xf32>
    %5 = vector.broadcast %3 : vector<1x128xf32> to vector<8x128xf32>
    %6 = arith.mulf %4, %5 : vector<8x128xf32>
    %7 = vector.extract_strided_slice %0 {offsets = [0, 1], sizes = [8, 1], strides = [1, 1]} : vector<8x2xf32> to vector<8x1xf32>
    %8 = vector.extract_strided_slice %1 {offsets = [1, 0], sizes = [1, 128], strides = [1, 1]} : vector<2x128xf32> to vector<1x128xf32>
    %9 = vector.broadcast %7 : vector<8x1xf32> to vector<8x128xf32>
    %10 = vector.broadcast %8 : vector<1x128xf32> to vector<8x128xf32>
    %11 = arith.mulf %9, %10 : vector<8x128xf32>
    %12 = arith.addf %6, %11 : vector<8x128xf32>
    %c0_3 = arith.constant 0 : index
    %c0_4 = arith.constant 0 : index
    %13 = vector.load %arg3[%c0_3, %c0_4] : memref<1x128xf32, #tpu.memory_space<vmem>>, vector<1x128xf32>
    %14 = vector.broadcast %13 : vector<1x128xf32> to vector<8x128xf32>
    %15 = arith.addf %12, %14 : vector<8x128xf32>
    %cst = arith.constant 0.000000e+00 : f32
    %16 = vector.broadcast %cst : f32 to vector<8x128xf32>
    %17 = arith.maximumf %15, %16 : vector<8x128xf32>
    %18 = arith.truncf %17 : vector<8x128xf32> to vector<8x128xbf16>
    %c0_5 = arith.constant 0 : index
    %c0_6 = arith.constant 0 : index
    %19 = vector.load %arg4[%c0_5, %c0_6] : memref<128x10xbf16, #tpu.memory_space<vmem>>, vector<128x10xbf16>
    %cst_7 = arith.constant dense<0.000000e+00> : vector<8x10xf32>
    %20 = tpu.matmul %18, %19, %cst_7 {dimension_numbers = #tpu.dot_dimension_numbers<[1], [0], [0], [1], [0, 0, 1, 1], [], []>} : vector<8x128xbf16>, vector<128x10xbf16>, vector<8x10xf32> -> vector<8x10xf32>
    %c0_8 = arith.constant 0 : index
    %c0_9 = arith.constant 0 : index
    %21 = vector.load %arg5[%c0_8, %c0_9] : memref<1x10xf32, #tpu.memory_space<vmem>>, vector<1x10xf32>
    %22 = vector.broadcast %21 : vector<1x10xf32> to vector<8x10xf32>
    %23 = arith.addf %20, %22 : vector<8x10xf32>
    %c0_10 = arith.constant 0 : index
    %c0_11 = arith.constant 0 : index
    %24 = vector.load %arg6[%c0_10, %c0_11] : memref<8x10xf32, #tpu.memory_space<vmem>>, vector<8x10xf32>
    tpu.vector_store %arg6[%c0_10, %c0_11], %23 {strides = array<i32>} : memref<8x10xf32, #tpu.memory_space<vmem>>, vector<8x10xf32>,
    return
  }
  func.func @transform_0(%arg0: i32) -> (i32, i32) {
    %c0_i32 = arith.constant 0 : i32
    %c0_i32_0 = arith.constant 0 : i32
    return %arg0, %c0_i32 : i32, i32
  }
  func.func @transform_1(%arg0: i32) -> (i32, i32) {
    %c0_i32 = arith.constant 0 : i32
    %c0_i32_0 = arith.constant 0 : i32
    %c0_i32_1 = arith.constant 0 : i32
    return %c0_i32, %c0_i32_0 : i32, i32
  }
  func.func @transform_2(%arg0: i32) -> (i32, i32) {
    %c0_i32 = arith.constant 0 : i32
    %c0_i32_0 = arith.constant 0 : i32
    %c0_i32_1 = arith.constant 0 : i32
    return %c0_i32, %c0_i32_0 : i32, i32
  }
  func.func @transform_3(%arg0: i32) -> (i32, i32) {
    %c0_i32 = arith.constant 0 : i32
    %c0_i32_0 = arith.constant 0 : i32
    %c0_i32_1 = arith.constant 0 : i32
    return %c0_i32, %c0_i32_0 : i32, i32
  }
  func.func @transform_4(%arg0: i32) -> (i32, i32) {
    %c0_i32 = arith.constant 0 : i32
    %c0_i32_0 = arith.constant 0 : i32
    %c0_i32_1 = arith.constant 0 : i32
    return %c0_i32, %c0_i32_0 : i32, i32
  }
  func.func @transform_5(%arg0: i32) -> (i32, i32) {
    %c0_i32 = arith.constant 0 : i32
    %c0_i32_0 = arith.constant 0 : i32
    return %arg0, %c0_i32 : i32, i32
  }
}

</mosaic_0001>

<bundles_post_ra>
// kernel: classifier_forward.1
= control target key start
LH: loop header
LB: loop body
LE: loop exit
PB: predicated region body
PF: predicated region fallthrough
CT: control target
= control target key end

     0   :  { %10 = vsyncpa [#allocation3], 0  ;;  %s710_s0 = inlined_call_operand.vmem [shape: f32[16,2], index: 0, kind: input, shape index: {}]   ;;  %s711_s1 = inlined_call_operand.vmem [shape: f32[2,128], index: 1, kind: input, shape index: {}]   ;;  %s712_s2 = inlined_call_operand.vmem [shape: f32[1,128], index: 2, kind: input, shape index: {}]   ;;  %s713_s3 = inlined_call_operand.vmem [shape: bf16[128,10], index: 3, kind: input, shape index: {}]   ;;  %s714_s4 = inlined_call_operand.vmem [shape: f32[1,10], index: 4, kind: input, shape index: {}]   ;;  %s715_s5 = inlined_call_operand.hbm [shape: f32[16,10], index: 5, kind: output, shape index: {}]  }
   0x1   :  { %12 = vsyncpa [#allocation3 + $0x1], 0  ;;  %s592_s18 = smov 0   ;;  %s594_s19 = smov 0  }
   0x2   :  { %s596_s20 = smov 0   ;;  %s598_s21 = smov 0  }
   0x3 LB: > { %s613_s22 = sadd.s32 4294967295, %s558_s21   ;;  %s401_s23 = sadd.s32 4294967294, %s558_s21   ;;  %s558_s21 = sphi %s598_s21, %s721_s21   ;;  %s554_s20 = sphi %s596_s20, %s720_s20   ;;  %s550_s19 = sphi %s594_s19, %s719_s19   ;;  %s546_s18 = sphi %s592_s18, %s718_s18  }
   0x4   : > { %s617_s24 = sadd.s32 1, %s558_s21   ;;  %s135_s25 = sadd.s32 1, %s554_s20 }
   0x5   : > { %s132_s26 = ssub.s32 %s558_s21, %s617_s24  ;;  %p145_p0 = scmp.ne.s32.totalorder %s554_s20, %s550_s19 }
   0x6   : > { %p133_p1 = scmp.eq.s32.totalorder %s132_s26, 0  ;;  %p146_p2 = scmp.eq.s32.totalorder %s613_s22, 1 }
   0x7   : > { %p151_p3 = scmp.ne.s32.totalorder %s550_s19, %s546_s18  ;;  %p152_p4 = scmp.eq.s32.totalorder %s401_s23, 1 }
   0x8   : > { %s628_s27 = scalar_select %p133_p1, %s554_s20, %s135_s25  }
   0x9   : > { %p630_p5 = por %p146_p2, %p145_p0  ;;  %p634_p6 = por %p152_p4, %p151_p3 }
   0xa   : > { %p404_p7 = scmp.ge.s32.totalorder %s558_s21, 1  ;;  %p189_p8 = scmp.lt.s32.totalorder %s558_s21, 3 }
   0xc   : > { %p190_p9 = pnand %p404_p7, %p189_p8 }
   0xd   : > { %p216_p10 = scmp.lt.s32.totalorder (!%p190_p9), %s613_s22, 1  ;;  %s213_s14 = sand.u32 (!%p190_p9), 1, %s550_s19  }
   0xe   : > { %193 = sbr.rel (%p190_p9) target bundleno = 292 (0x124), region = 40  ;;  %s440_s15 = sshll.u32 (!%p190_p9), %s613_s22, 3 }
   0xf   : > { %s405_s16 = sshll.u32 (!%p190_p9), %s213_s14, 3  ;;  %s337_s25 = scalar_lea.hbm (!%p190_p9), %s715_s5, %s440_s15 }
  0x10   : > { %s215_s6 = scalar_lea.vmem (!%p190_p9), [#allocation2], %s405_s16  ;;  %s341_s8 = sshll.u32 (!%p190_p9), %s337_s25, 4  ;;  %s342_s8 = int_to_ptr.hbm [resolvable:$true] %s341_s8 }
  0x11   : > { %s510_s9 = sshra.s32 (!%p190_p9), %s342_s8, 4  ;;  %s511_s9 = int_to_ptr.hbm [resolvable:$true] %s510_s9 }
  0x12   : > { %p517_p0 = scmp.lt.s32.totalorder (!%p190_p9), %s511_s9, %s715_s5 }
  0x13   : > { %v450_v0 = vld [vmem:[%s713_s3 + $0x38] sm:$0xff]  ;;  %v560_v1 = vmov 0   ;;  %s217_s7 = scalar_select %p216_p10, %s613_s22, 1  ;;  %v449_v2 = vld [vmem:[%s713_s3 + $0x30] sm:$0xff]  ;;  %v448_v4 = vld [vmem:[%s713_s3 + $0x28] sm:$0xff]  ;;  %v561_v5 = vmov 1  }
  0x14   : > { %492 = vset.pattern.permute.xlu0 %v560_v1  ;;  %311 = vmatpush.bf16.msra.mxu0 %v450_v0  ;;  %v447_v6 = vld [vmem:[%s713_s3 + $0x20] sm:$0xff]  ;;  %v446_v7 = vld [vmem:[%s713_s3 + $0x18] sm:$0xff]  ;;  %v445_v8 = vld [vmem:[%s713_s3 + $0x10] sm:$0xff]  ;;  %vm324_vm0 = vcmask 80896   ;;  %s327_s22 = scalar_lea.sflag [#allocation3], %s213_s14 }
  0x15   : > { %s406_s10 = sshll.u32 %s217_s7, 3  ;;  %v444_v9 = vld [vmem:[%s713_s3 + $0x8] sm:$0xff]  ;;  %v443_v10 = vld [vmem:[%s713_s3] sm:$0xff]  ;;  %s339_s7 = sshll.u32 %s215_s6, 4  ;;  %s340_s7 = int_to_ptr.vmem [resolvable:$true] %s339_s7 }
  0x16   : > { %s219_s13 = scalar_lea.vmem %s710_s0, %s406_s10  ;;  %v221_v12 = vld [vmem:[%s711_s1] sm:$0x3]  ;;  %s512_s10 = scalar_lea.hbm %s511_s9, 8 }
  0x17   : > { %v220_v3 = vld [vmem:[%s219_s13] sm:$0xff]  ;;  %v227_v13 = vperm.slane %v221_v12, 0  ;;  %v233_v14 = vperm.slane %v221_v12, 1  ;;  %p513_p11 = scmp.ne.s32.totalorder %s511_s9, %s512_s10  ;;  %s516_s13 = scalar_lea.hbm %s715_s5, 16 }
  0x18   : > { %312 = vmatpush.bf16.msra.mxu0 %v449_v2  ;;  %224 = vperm.xlu0 %492, %v220_v3   ;;  %v494_v18 = vld [vmem:[%s712_s2] ss:$0 sm:$0xff]  ;;  %p518_p1 = scmp.lt.s32.totalorder %s516_s13, %s512_s10 }
  0x19   : > { %v495_v23 = vld [vmem:[%s714_s4] ss:$0 sm:$0xff]  ;;  %p514_p12 = pnand %p513_p11, %p630_p5 }
  0x1a   : > { %p519_p2 = por %p518_p1, %p517_p0 }
  0x1b   : > { %p515_p13 = pneg %p514_p12 }
  0x1c   : > { %313 = vmatpush.bf16.msra.mxu0 %v448_v4 }
  0x1d   : > { %p520_p3 = pnand %p519_p2, %p515_p13 }
  0x20   : > { %493 = vset.pattern.permute.xlu0 %v561_v5  ;;  %314 = vmatpush.bf16.msra.mxu0 %v447_v6 }
  0x21   : > { %230 = vperm.xlu0 %493, %v220_v3  }
  0x24   : > { %315 = vmatpush.bf16.msra.mxu0 %v446_v7 }
  0x28   : > { %316 = vmatpush.bf16.msra.mxu0 %v445_v8 }
  0x2c   : > { %317 = vmatpush.bf16.msra.mxu0 %v444_v9 }
  0x30   : > { %318 = vmatpush.bf16.msra.mxu0 %v443_v10 }
  0x8a   : > { %v225_v11 = vpop.permute.xlu0 %224 }
  0x8b   : > { %v228_v16 = vmul.f32 %v227_v13, %v225_v11 }
  0x93   : > { %v231_v15 = vpop.permute.xlu0 %230 }
  0x94   : > { %v234_v17 = vmul.f32 %v233_v14, %v231_v15 }
  0x96   : > { %v235_v19 = vadd.f32 %v234_v17, %v228_v16 }
  0x98   : > { %v240_v20 = vadd.f32 %v494_v18, %v235_v19 }
  0x9a   : > { %v241_v21 = vmax.f32 %v240_v20, 0.0 }
  0x9c   : > { %v242_v22 = vpack.c.bf16 %v241_v21, %v241_v21 }
  0x9e   : > { %319 = vmatmul.bf16.vlgmr.msra.gmra.mxu0 %v242_v22 }
 0x11b   : > { %v320_v24 = vpop.f32.mrf.mxu0 }
 0x11c   : > { %v321_v25 = vadd.f32 %v495_v23, %v320_v24 }
 0x11e   : > { %325 = vst.msk [vmem:[%s215_s6] sm:$0xff] %vm324_vm0, %v321_v25 }
 0x11f   : > { %523 = shalt.err (!%p520_p3)
}
 0x120   : > { %451 = dma.vmem_to_hbm [thread:$0]  (%p630_p5), %s340_s7, 128, %s342_s8, %s327_s22  }
 0x123   : > { %v322_v26 = vpop.f32.mrf.mxu0 }
 0x124 PF: > { %p457_p4 = scmp.ge.s32.totalorder %s558_s21, 2  ;;  %s353_s14 = sand.u32 1, %s546_s18  }
 0x125   : > { %s354_s17 = scalar_lea.sflag [#allocation3], %s353_s14 }
 0x126   : > { %p454_p7 = pnand %p457_p4, %p634_p6 }
 0x128   : > { %p455_p8 = pneg %p454_p7 }
 0x12a   : > { %541 = dma.done.wait (%p455_p8), %s354_s17, 128  }
 0x12b   : > { %543 = vsyncadd (%p455_p8), %s354_s17, 4294967168  ;;  %p15_p9 = scmp.ge.s32.totalorder %s617_s24, 4   ;;  %s718_s18 = smov %s550_s19 }
 0x12c   : > { %s719_s19 = smov %s554_s20  ;;  %s720_s20 = smov %s628_s27 }
 0x12d   : > { %s721_s21 = smov %s617_s24  ;;  %17 = sbr.rel (!%p15_p9) target bundleno = 3 (0x3), region = 75 }
 0x132   :  { %360 = vsyncpa [#allocation3], 1 }
 0x133   :  { %362 = vsyncpa [#allocation3 + $0x1], 1 }

</bundles_post_ra>
